<compile_context>
chip_gen: v7x
topology: tpu7x:2x2x1
jax: 0.10.0
libtpu: 0.0.40
codegen_flags: <defaults>
</compile_context>

<pallas_src>
import functools

import jax
import jax.numpy as jnp
from jax.experimental import pallas as pl
from jax.experimental.pallas import tpu as pltpu

LRELU_SLOPE = 0.1


def get_padding(kernel_size, dilation=1):
    return int((kernel_size * dilation - dilation) / 2)


# ----------------------------------------------------------------------------
# Pallas kernels: one kernel invocation handles a block of whole "images"
# (an image = one (b, w) column of the period-reshaped input), with the full
# folded H extent and all channels resident, so the K' taps are plain static
# slices and every tap is one MXU matmul accumulated in f32.
# ----------------------------------------------------------------------------
def _taps_matmul(x_ref, w_ref, m, k_taps, h_out):
    xm = x_ref[m]                                         # (Hf, C') bf16
    acc = jnp.dot(xm[0:h_out, :], w_ref[0],
                  preferred_element_type=jnp.float32)
    for q in range(1, k_taps):
        acc = acc + jnp.dot(xm[q:q + h_out, :], w_ref[q],
                            preferred_element_type=jnp.float32)
    return acc


def _conv_act_kernel(x_ref, w_ref, b_ref, y_ref, *, k_taps, h_out, slope):
    # x_ref: (NI, Hf, C') bf16 ; w_ref: (K', C', C_out) bf16 (VMEM resident)
    # b_ref: (1, C_out) f32    ; y_ref: (NI, H_out, C_out) bf16
    def body(m, carry):
        acc = _taps_matmul(x_ref, w_ref, m, k_taps, h_out)
        acc = acc + b_ref[...]
        act = jnp.maximum(acc, slope * acc)               # leaky_relu in f32
        y_ref[m] = act.astype(y_ref.dtype)
        return carry
    jax.lax.fori_loop(0, x_ref.shape[0], body, None)


def _conv_act_post_kernel(x_ref, w_ref, b_ref, wp_ref, y_ref, z_ref, *,
                          k_taps, h_out, slope):
    # Last 1024->1024 layer with conv_post's channel contraction fused into
    # the epilogue: z[m, h, k] = sum_c leaky_relu(conv4)[m, h, c] * wp[c, k].
    def body(m, carry):
        acc = _taps_matmul(x_ref, w_ref, m, k_taps, h_out)
        acc = acc + b_ref[...]
        act = jnp.maximum(acc, slope * acc)
        yb = act.astype(y_ref.dtype)
        y_ref[m] = yb
        z_ref[m] = jnp.dot(yb, wp_ref[...], preferred_element_type=jnp.float32)
        return carry
    jax.lax.fori_loop(0, x_ref.shape[0], body, None)


# ----------------------------------------------------------------------------
# VMEM / tile-size helpers (generation aware, lane/sublane-padding aware)
# ----------------------------------------------------------------------------
def _round_up(x, m):
    return ((x + m - 1) // m) * m


def _tile_bytes(shape, itemsize):
    """VMEM bytes of one buffer: last dim -> 128 lanes, 2nd-to-last -> sublane
    tile of the dtype (8 rows * 32/bits packing)."""
    s = list(shape)
    if len(s) == 1:
        s = [1] + s
    sub = 8 * max(1, 4 // itemsize)
    s[-1] = _round_up(int(s[-1]), 128)
    s[-2] = _round_up(int(s[-2]), sub)
    n = 1
    for d in s:
        n *= int(d)
    return n * itemsize


def _vmem_capacity_bytes():
    try:
        info = pltpu.get_tpu_info()
        cap = int(getattr(info, "vmem_capacity_bytes", 0))
        if cap > 0:
            return cap
    except Exception:
        pass
    return 64 << 20          # conservative default (v7x per-core VMEM)


def _pick_ni(m_img, per_img_bytes, resident_bytes, vmem_budget):
    """Images per grid block: fit the double-buffered activation tiles in the
    budget, and keep >= 2 (target 4) grid blocks so v7x's two TensorCores
    both get work and the DMA pipeline stays busy."""
    headroom = 6 << 20
    avail = max(vmem_budget - resident_bytes - headroom, 2 * per_img_bytes)
    ni_vmem = max(1, avail // (2 * max(per_img_bytes, 1)))
    target_blocks = max(1, min(m_img, 4))
    ni_blocks = -(-m_img // target_blocks)
    return int(max(1, min(ni_vmem, ni_blocks, m_img)))


# ----------------------------------------------------------------------------
# One conv layer (optionally with the fused conv_post matvec) via pallas_call
# ----------------------------------------------------------------------------
def _conv_layer(xf, w_fold, bias, k_taps, h_out, *, w_post=None,
                max_images_per_block=None):
    m_img, hf, cp = xf.shape
    c_out = w_fold.shape[-1]
    fused = w_post is not None

    cap = _vmem_capacity_bytes()
    budget = int(0.70 * cap)

    res_bytes = _tile_bytes((k_taps, cp, c_out), 2) + _tile_bytes((1, c_out), 4)
    per_img = _tile_bytes((hf, cp), 2) + _tile_bytes((h_out, c_out), 2)
    if fused:
        res_bytes += _tile_bytes(w_post.shape, 2)
        per_img += _tile_bytes((h_out, w_post.shape[-1]), 4)

    ni = _pick_ni(m_img, per_img, res_bytes, budget)
    if max_images_per_block is not None:
        ni = max(1, min(ni, int(max_images_per_block)))
    grid = (pl.cdiv(m_img, ni),)

    # Generous upper bound (residents counted twice in case the Buffered(1)
    # fallback path is taken), capped below physical capacity.
    need = 2 * res_bytes + 2 * ni * per_img + (8 << 20)
    vmem_limit = int(min(max(need, 32 << 20), int(0.9 * cap)))

    bias2d = bias.reshape(1, c_out).astype(jnp.float32)

    def build(single_buffer_residents):
        def rspec(shape):
            imap = lambda i, _n=len(shape): (0,) * _n
            if single_buffer_residents:
                return pl.BlockSpec(shape, imap, pipeline_mode=pl.Buffered(1))
            return pl.BlockSpec(shape, imap)

        in_specs = [
            pl.BlockSpec((ni, hf, cp), lambda i: (i, 0, 0)),   # activations
            rspec((k_taps, cp, c_out)),                         # folded weight
            rspec((1, c_out)),                                  # bias (f32)
        ]
        operands = [xf, w_fold, bias2d]
        out_shape = jax.ShapeDtypeStruct((m_img, h_out, c_out), jnp.bfloat16)
        out_specs = pl.BlockSpec((ni, h_out, c_out), lambda i: (i, 0, 0))

        if fused:
            kp = w_post.shape[-1]
            in_specs.append(rspec((c_out, kp)))
            operands.append(w_post)
            out_shape = (out_shape,
                         jax.ShapeDtypeStruct((m_img, h_out, kp), jnp.float32))
            out_specs = [out_specs,
                         pl.BlockSpec((ni, h_out, kp), lambda i: (i, 0, 0))]
            kernel = functools.partial(_conv_act_post_kernel, k_taps=k_taps,
                                       h_out=h_out, slope=LRELU_SLOPE)
        else:
            kernel = functools.partial(_conv_act_kernel, k_taps=k_taps,
                                       h_out=h_out, slope=LRELU_SLOPE)

        return pl.pallas_call(
            kernel,
            out_shape=out_shape,
            grid_spec=pltpu.PrefetchScalarGridSpec(
                num_scalar_prefetch=0,
                grid=grid,
                in_specs=in_specs,
                out_specs=out_specs,
            ),
            compiler_params=pltpu.CompilerParams(
                dimension_semantics=("parallel",),
                vmem_limit_bytes=vmem_limit,
            ),
        )(*operands)

    try:
        return build(True)
    except Exception:
        # Older Pallas without pipeline_mode / Buffered(1): fall back to the
        # default double-buffered resident operands.
        return build(False)


# ----------------------------------------------------------------------------
# XLA glue: stride folding (phases of H merged into channels) + weight folding
# ----------------------------------------------------------------------------
def _fold_input(y, k, stride, pad):
    # y: (M, H, C) bf16 -> (M, Hf, stride*C) bf16, with zero padding so that
    # the layer becomes a stride-1, K'=ceil(K/stride)-tap conv over Hf rows.
    m, h, c = y.shape
    h_out = (h + 2 * pad - k) // stride + 1
    kf = -(-k // stride)
    hf = max(h_out + kf - 1, -(-(h + pad) // stride))
    right = hf * stride - pad - h
    assert right >= 0
    yp = jnp.pad(y, ((0, 0), (pad, right), (0, 0)))
    return yp.reshape(m, hf, stride * c), h_out, kf


def _fold_weight(w, stride):
    # w: (C_out, C_in, K, 1) torch layout -> (K', stride*C_in, C_out) so that
    # out[h] = sum_q xf[h+q] @ W'[q].
    c_out, c_in, k, _ = w.shape
    kf = -(-k // stride)
    wt = w[..., 0]                                         # (C_out, C_in, K)
    wt = jnp.pad(wt, ((0, 0), (0, 0), (0, kf * stride - k)))
    wt = wt.reshape(c_out, c_in, kf, stride)               # k = q*stride + r
    wt = jnp.transpose(wt, (2, 3, 1, 0))                   # (K', s, C_in, C_out)
    return wt.reshape(kf, stride * c_in, c_out)


# ----------------------------------------------------------------------------
# Parameter init (deterministic; weight_norm is identity at init)
# ----------------------------------------------------------------------------
def init_params(key, kernel_size=5):
    cfgs = [
        (1, 32, kernel_size),
        (32, 128, kernel_size),
        (128, 512, kernel_size),
        (512, 1024, kernel_size),
        (1024, 1024, kernel_size),
        (1024, 1, 3),                                      # conv_post
    ]
    params = []
    for cin, cout, k in cfgs:
        key, wk, bk = jax.random.split(key, 3)
        fan_in = cin * k
        w = jax.random.normal(wk, (cout, cin, k, 1), jnp.float32) / jnp.sqrt(
            jnp.float32(fan_in))
        b = jax.random.normal(bk, (cout,), jnp.float32) * 0.01
        params.append((w, b))
    return params


# ----------------------------------------------------------------------------
# Full forward pass (Pallas path)
# ----------------------------------------------------------------------------
def discriminator_p_forward(x, params, period, stride=3, fmap_nchw=True,
                            max_images_per_block=None):
    # x: (B, 1, T) f32, same as the torch module.  fmap_nchw=False keeps the
    # fmap entries in the kernel-native (B, W, H, C) layout and skips five
    # full-activation HBM transposes (values are identical modulo layout).
    b, c, t = x.shape
    if t % period != 0:
        n_pad = period - t % period
        x = jnp.pad(x, ((0, 0), (0, 0), (0, n_pad)), mode="reflect")
        t = t + n_pad
    h = t // period
    x = x.reshape(b, c, h, period)                         # NCHW, W = period
    y = jnp.transpose(x, (0, 3, 2, 1)).reshape(b * period, h, c)
    y = y.astype(jnp.bfloat16)                             # (B*W, H, C=1)

    fmaps_native = []
    n_convs = len(params) - 1                              # 5 convs + conv_post
    zn = None
    for i in range(n_convs):
        w, bias = params[i]
        k = w.shape[2]
        c_out = w.shape[0]
        pad = get_padding(k, 1)
        s = stride if i < n_convs - 1 else 1               # convs 0..3 stride 3
        xf, h_out, kf = _fold_input(y, k, s, pad)
        w_fold = _fold_weight(w, s).astype(jnp.bfloat16)

        if i < n_convs - 1:
            y = _conv_layer(xf, w_fold, bias, kf, h_out,
                            max_images_per_block=max_images_per_block)
        else:
            w_post = params[-1][0][0, :, :, 0].astype(jnp.bfloat16)   # (1024, 3)
            y, zn = _conv_layer(xf, w_fold, bias, kf, h_out, w_post=w_post,
                                max_images_per_block=max_images_per_block)
        fmaps_native.append(y)                             # (B*W, H_out, C_out)

    # conv_post: combine the per-tap matvec results (K=3, pad=1, stride 1).
    #   out[h] = z[h-1, 0] + z[h, 1] + z[h+1, 2] + bias
    b_post = params[-1][1]
    h4 = zn.shape[1]
    zp = jnp.pad(zn, ((0, 0), (1, 1), (0, 0)))
    post = (zp[:, 0:h4, 0] + zp[:, 1:h4 + 1, 1] + zp[:, 2:h4 + 2, 2]
            + b_post[0])                                   # (B*W, H4) f32
    post = post.reshape(b, period, h4)
    post_nchw = jnp.transpose(post, (0, 2, 1))[:, None, :, :]   # (B, 1, H4, W)
    out = post_nchw.reshape(b, -1)                         # torch.flatten(x, 1, -1)

    fmap = []
    for f in fmaps_native:
        mm, hh, cc = f.shape
        f4 = f.reshape(b, period, hh, cc)                  # (B, W, H, C)
        fmap.append(jnp.transpose(f4, (0, 3, 2, 1)) if fmap_nchw else f4)
    fmap.append(post_nchw if fmap_nchw else post.reshape(b, period, h4, 1))
    return out, fmap


# ----------------------------------------------------------------------------
# Pure-JAX reference (lax conv), matching the kernel's bf16/f32 precision path
# ----------------------------------------------------------------------------
def ref_forward(x, params, period, stride=3, slope=LRELU_SLOPE):
    b, c, t = x.shape
    if t % period != 0:
        n_pad = period - t % period
        x = jnp.pad(x, ((0, 0), (0, 0), (0, n_pad)), mode="reflect")
        t = t + n_pad
    x = x.reshape(b, c, t // period, period)
    h = x.astype(jnp.bfloat16)
    fmap = []
    n = len(params)
    for i, (w, bias) in enumerate(params):
        k = w.shape[2]
        pad = get_padding(k, 1)
        s = stride if i < 4 else 1
        y = jax.lax.conv_general_dilated(
            h, w.astype(jnp.bfloat16), window_strides=(s, 1),
            padding=((pad, pad), (0, 0)),
            dimension_numbers=("NCHW", "OIHW", "NCHW"),
            preferred_element_type=jnp.float32)
        y = y + bias[None, :, None, None]
        if i < n - 1:
            y = jnp.where(y >= 0, y, slope * y)
            h = y.astype(jnp.bfloat16)                     # bf16 at layer boundary
            fmap.append(h)
        else:
            fmap.append(y)                                 # conv_post stays f32
    return fmap[-1].reshape(b, -1), fmap


if __name__ == "__main__":
    key = jax.random.PRNGKey(0)
    pkey, xkey = jax.random.split(key)
    params = init_params(pkey)

    B, C, T = 2, 1, 47          # T % period != 0 -> exercises the reflect-pad branch
    period = 3
    x = jax.random.normal(xkey, (B, C, T), jnp.float32)

    ref_out, ref_fmap = ref_forward(x, params, period)
    ref_out = jax.block_until_ready(ref_out)

    # Default tiling, then a forced small block count to exercise the
    # multi-block grid and the masked partial last block.
    for max_imgs in (None, 4):
        out, fmap = discriminator_p_forward(x, params, period,
                                            max_images_per_block=max_imgs)
        out = jax.block_until_ready(out)
        fmap = [jax.block_until_ready(f) for f in fmap]

        assert out.shape == ref_out.shape, (out.shape, ref_out.shape)
        assert jnp.allclose(out.astype(jnp.float32), ref_out.astype(jnp.float32),
                            atol=3e-2, rtol=3e-2), "final output mismatch"
        assert len(fmap) == len(ref_fmap)
        for a, r in zip(fmap, ref_fmap):
            assert a.shape == r.shape, (a.shape, r.shape)
            assert jnp.allclose(a.astype(jnp.float32), r.astype(jnp.float32),
                                atol=3e-2, rtol=3e-2), "fmap mismatch"

    # Perf-mode fmap layout (no NCHW transposes): final output must still match.
    out_native, fmap_native = discriminator_p_forward(x, params, period,
                                                      fmap_nchw=False)
    out_native = jax.block_until_ready(out_native)
    assert jnp.allclose(out_native.astype(jnp.float32),
                        ref_out.astype(jnp.float32),
                        atol=3e-2, rtol=3e-2), "native-layout output mismatch"

    print("KERNEL_OK")
</pallas_src>

<mosaic_0001>
module attributes {stable_mosaic.version = 11 : i64} {
  func.func @_conv_act_kernel(%arg0: i32, %arg1: memref<2x7x3xbf16, #tpu.memory_space<vmem>>, %arg2: memref<2x3x32xbf16, #tpu.memory_space<vmem>>, %arg3: memref<1x32xf32, #tpu.memory_space<vmem>>, %arg4: memref<2x6x32xbf16, #tpu.memory_space<vmem>>) attributes {dimension_semantics = [#tpu.dimension_semantics<parallel>], iteration_bounds = array<i64: 3>, scalar_prefetch = 0 : i64, scratch_operands = 0 : i64, tpu.core_type = #tpu.core_type<tc>, window_params = [{transform_indices = @transform_0, window_bounds = array<i64: 2, 7, 3>}, {pipeline_mode = #tpu.pipeline_mode<synchronous>, transform_indices = @transform_1, window_bounds = array<i64: 2, 3, 32>}, {pipeline_mode = #tpu.pipeline_mode<synchronous>, transform_indices = @transform_2, window_bounds = array<i64: 1, 32>}, {transform_indices = @transform_3, window_bounds = array<i64: 2, 6, 32>}]} {
    %c0_i32 = arith.constant 0 : i32
    %c2_i32 = arith.constant 2 : i32
    %0 = arith.addi %c0_i32, %c2_i32 : i32
    %c1_i32 = arith.constant 1 : i32
    scf.for %arg5 = %c0_i32 to %0 step %c1_i32  : i32 {
      %1 = arith.index_cast %arg5 : i32 to index
      %c0 = arith.constant 0 : index
      %c0_1 = arith.constant 0 : index
      %2 = vector.load %arg1[%1, %c0, %c0_1] : memref<2x7x3xbf16, #tpu.memory_space<vmem>>, vector<1x7x3xbf16>
      %3 = vector.shape_cast %2 : vector<1x7x3xbf16> to vector<7x3xbf16>
      %4 = vector.extract_strided_slice %3 {offsets = [0, 0], sizes = [6, 3], strides = [1, 1]} : vector<7x3xbf16> to vector<6x3xbf16>
      %c0_2 = arith.constant 0 : index
      %c0_3 = arith.constant 0 : index
      %c0_4 = arith.constant 0 : index
      %5 = vector.load %arg2[%c0_2, %c0_3, %c0_4] : memref<2x3x32xbf16, #tpu.memory_space<vmem>>, vector<1x3x32xbf16>
      %6 = vector.shape_cast %5 : vector<1x3x32xbf16> to vector<3x32xbf16>
      %cst = arith.constant dense<0.000000e+00> : vector<6x32xf32>
      %7 = tpu.matmul %4, %6, %cst {dimension_numbers = #tpu.dot_dimension_numbers<[1], [0], [0], [1], [0, 0, 1, 1], [], []>} : vector<6x3xbf16>, vector<3x32xbf16>, vector<6x32xf32> -> vector<6x32xf32>
      %8 = vector.extract_strided_slice %3 {offsets = [1, 0], sizes = [6, 3], strides = [1, 1]} : vector<7x3xbf16> to vector<6x3xbf16>
      %c1 = arith.constant 1 : index
      %c0_5 = arith.constant 0 : index
      %c0_6 = arith.constant 0 : index
      %9 = vector.load %arg2[%c1, %c0_5, %c0_6] : memref<2x3x32xbf16, #tpu.memory_space<vmem>>, vector<1x3x32xbf16>
      %10 = vector.shape_cast %9 : vector<1x3x32xbf16> to vector<3x32xbf16>
      %cst_7 = arith.constant dense<0.000000e+00> : vector<6x32xf32>
      %11 = tpu.matmul %8, %10, %cst_7 {dimension_numbers = #tpu.dot_dimension_numbers<[1], [0], [0], [1], [0, 0, 1, 1], [], []>} : vector<6x3xbf16>, vector<3x32xbf16>, vector<6x32xf32> -> vector<6x32xf32>
      %12 = arith.addf %7, %11 : vector<6x32xf32>
      %c0_8 = arith.constant 0 : index
      %c0_9 = arith.constant 0 : index
      %13 = vector.load %arg3[%c0_8, %c0_9] : memref<1x32xf32, #tpu.memory_space<vmem>>, vector<1x32xf32>
      %14 = vector.broadcast %13 : vector<1x32xf32> to vector<6x32xf32>
      %15 = arith.addf %12, %14 : vector<6x32xf32>
      %cst_10 = arith.constant 1.000000e-01 : f32
      %16 = vector.broadcast %cst_10 : f32 to vector<6x32xf32>
      %17 = arith.mulf %16, %15 : vector<6x32xf32>
      %18 = arith.maximumf %15, %17 : vector<6x32xf32>
      %19 = arith.truncf %18 : vector<6x32xf32> to vector<6x32xbf16>
      %20 = arith.index_cast %arg5 : i32 to index
      %c0_11 = arith.constant 0 : index
      %c0_12 = arith.constant 0 : index
      %21 = vector.load %arg4[%20, %c0_11, %c0_12] : memref<2x6x32xbf16, #tpu.memory_space<vmem>>, vector<1x6x32xbf16>
      %22 = vector.shape_cast %21 : vector<1x6x32xbf16> to vector<6x32xbf16>
      %23 = vector.shape_cast %19 : vector<6x32xbf16> to vector<1x6x32xbf16>
      tpu.vector_store %arg4[%20, %c0_11, %c0_12], %23 {strides = array<i32>} : memref<2x6x32xbf16, #tpu.memory_space<vmem>>, vector<1x6x32xbf16>,
    }
    %c2_i32_0 = arith.constant 2 : i32
    return
  }
  func.func @transform_0(%arg0: i32) -> (i32, i32, i32) {
    %c0_i32 = arith.constant 0 : i32
    %c0_i32_0 = arith.constant 0 : i32
    %c0_i32_1 = arith.constant 0 : i32
    return %arg0, %c0_i32, %c0_i32_0 : i32, i32, i32
  }
  func.func @transform_1(%arg0: i32) -> (i32, i32, i32) {
    %c0_i32 = arith.constant 0 : i32
    %c0_i32_0 = arith.constant 0 : i32
    %c0_i32_1 = arith.constant 0 : i32
    %c0_i32_2 = arith.constant 0 : i32
    return %c0_i32, %c0_i32_0, %c0_i32_1 : i32, i32, i32
  }
  func.func @transform_2(%arg0: i32) -> (i32, i32) {
    %c0_i32 = arith.constant 0 : i32
    %c0_i32_0 = arith.constant 0 : i32
    %c0_i32_1 = arith.constant 0 : i32
    return %c0_i32, %c0_i32_0 : i32, i32
  }
  func.func @transform_3(%arg0: i32) -> (i32, i32, i32) {
    %c0_i32 = arith.constant 0 : i32
    %c0_i32_0 = arith.constant 0 : i32
    %c0_i32_1 = arith.constant 0 : i32
    return %arg0, %c0_i32, %c0_i32_0 : i32, i32, i32
  }
}

module attributes {stable_mosaic.version = 11 : i64} {
  func.func @_conv_act_kernel(%arg0: i32, %arg1: memref<2x7x3xbf16, #tpu.memory_space<vmem>>, %arg2: memref<2x3x32xbf16, #tpu.memory_space<vmem>>, %arg3: memref<1x32xf32, #tpu.memory_space<vmem>>, %arg4: memref<2x6x32xbf16, #tpu.memory_space<vmem>>) attributes {dimension_semantics = [#tpu.dimension_semantics<parallel>], iteration_bounds = array<i64: 3>, scalar_prefetch = 0 : i64, scratch_operands = 0 : i64, tpu.core_type = #tpu.core_type<tc>, window_params = [{transform_indices = @transform_0, window_bounds = array<i64: 2, 7, 3>}, {pipeline_mode = #tpu.pipeline_mode<synchronous>, transform_indices = @transform_1, window_bounds = array<i64: 2, 3, 32>}, {pipeline_mode = #tpu.pipeline_mode<synchronous>, transform_indices = @transform_2, window_bounds = array<i64: 1, 32>}, {transform_indices = @transform_3, window_bounds = array<i64: 2, 6, 32>}]} {
    %c0_i32 = arith.constant 0 : i32
    %c2_i32 = arith.constant 2 : i32
    %0 = arith.addi %c0_i32, %c2_i32 : i32
    %c1_i32 = arith.constant 1 : i32
    scf.for %arg5 = %c0_i32 to %0 step %c1_i32  : i32 {
      %1 = arith.index_cast %arg5 : i32 to index
      %c0 = arith.constant 0 : index
      %c0_1 = arith.constant 0 : index
      %2 = vector.load %arg1[%1, %c0, %c0_1] : memref<2x7x3xbf16, #tpu.memory_space<vmem>>, vector<1x7x3xbf16>
      %3 = vector.shape_cast %2 : vector<1x7x3xbf16> to vector<7x3xbf16>
      %4 = vector.extract_strided_slice %3 {offsets = [0, 0], sizes = [6, 3], strides = [1, 1]} : vector<7x3xbf16> to vector<6x3xbf16>
      %c0_2 = arith.constant 0 : index
      %c0_3 = arith.constant 0 : index
      %c0_4 = arith.constant 0 : index
      %5 = vector.load %arg2[%c0_2, %c0_3, %c0_4] : memref<2x3x32xbf16, #tpu.memory_space<vmem>>, vector<1x3x32xbf16>
      %6 = vector.shape_cast %5 : vector<1x3x32xbf16> to vector<3x32xbf16>
      %cst = arith.constant dense<0.000000e+00> : vector<6x32xf32>
      %7 = tpu.matmul %4, %6, %cst {dimension_numbers = #tpu.dot_dimension_numbers<[1], [0], [0], [1], [0, 0, 1, 1], [], []>} : vector<6x3xbf16>, vector<3x32xbf16>, vector<6x32xf32> -> vector<6x32xf32>
      %8 = vector.extract_strided_slice %3 {offsets = [1, 0], sizes = [6, 3], strides = [1, 1]} : vector<7x3xbf16> to vector<6x3xbf16>
      %c1 = arith.constant 1 : index
      %c0_5 = arith.constant 0 : index
      %c0_6 = arith.constant 0 : index
      %9 = vector.load %arg2[%c1, %c0_5, %c0_6] : memref<2x3x32xbf16, #tpu.memory_space<vmem>>, vector<1x3x32xbf16>
      %10 = vector.shape_cast %9 : vector<1x3x32xbf16> to vector<3x32xbf16>
      %cst_7 = arith.constant dense<0.000000e+00> : vector<6x32xf32>
      %11 = tpu.matmul %8, %10, %cst_7 {dimension_numbers = #tpu.dot_dimension_numbers<[1], [0], [0], [1], [0, 0, 1, 1], [], []>} : vector<6x3xbf16>, vector<3x32xbf16>, vector<6x32xf32> -> vector<6x32xf32>
      %12 = arith.addf %7, %11 : vector<6x32xf32>
      %c0_8 = arith.constant 0 : index
      %c0_9 = arith.constant 0 : index
      %13 = vector.load %arg3[%c0_8, %c0_9] : memref<1x32xf32, #tpu.memory_space<vmem>>, vector<1x32xf32>
      %14 = vector.broadcast %13 : vector<1x32xf32> to vector<6x32xf32>
      %15 = arith.addf %12, %14 : vector<6x32xf32>
      %cst_10 = arith.constant 1.000000e-01 : f32
      %16 = vector.broadcast %cst_10 : f32 to vector<6x32xf32>
      %17 = arith.mulf %16, %15 : vector<6x32xf32>
      %18 = arith.maximumf %15, %17 : vector<6x32xf32>
      %19 = arith.truncf %18 : vector<6x32xf32> to vector<6x32xbf16>
      %20 = arith.index_cast %arg5 : i32 to index
      %c0_11 = arith.constant 0 : index
      %c0_12 = arith.constant 0 : index
      %21 = vector.load %arg4[%20, %c0_11, %c0_12] : memref<2x6x32xbf16, #tpu.memory_space<vmem>>, vector<1x6x32xbf16>
      %22 = vector.shape_cast %21 : vector<1x6x32xbf16> to vector<6x32xbf16>
      %23 = vector.shape_cast %19 : vector<6x32xbf16> to vector<1x6x32xbf16>
      tpu.vector_store %arg4[%20, %c0_11, %c0_12], %23 {strides = array<i32>} : memref<2x6x32xbf16, #tpu.memory_space<vmem>>, vector<1x6x32xbf16>,
    }
    %c2_i32_0 = arith.constant 2 : i32
    return
  }
  func.func @transform_0(%arg0: i32) -> (i32, i32, i32) {
    %c0_i32 = arith.constant 0 : i32
    %c0_i32_0 = arith.constant 0 : i32
    %c0_i32_1 = arith.constant 0 : i32
    return %arg0, %c0_i32, %c0_i32_0 : i32, i32, i32
  }
  func.func @transform_1(%arg0: i32) -> (i32, i32, i32) {
    %c0_i32 = arith.constant 0 : i32
    %c0_i32_0 = arith.constant 0 : i32
    %c0_i32_1 = arith.constant 0 : i32
    %c0_i32_2 = arith.constant 0 : i32
    return %c0_i32, %c0_i32_0, %c0_i32_1 : i32, i32, i32
  }
  func.func @transform_2(%arg0: i32) -> (i32, i32) {
    %c0_i32 = arith.constant 0 : i32
    %c0_i32_0 = arith.constant 0 : i32
    %c0_i32_1 = arith.constant 0 : i32
    return %c0_i32, %c0_i32_0 : i32, i32
  }
  func.func @transform_3(%arg0: i32) -> (i32, i32, i32) {
    %c0_i32 = arith.constant 0 : i32
    %c0_i32_0 = arith.constant 0 : i32
    %c0_i32_1 = arith.constant 0 : i32
    return %arg0, %c0_i32, %c0_i32_0 : i32, i32, i32
  }
}

</mosaic_0001>

<bundles_post_ra>
// kernel: tpu_custom_call.1
= control target key start
LH: loop header
LB: loop body
LE: loop exit
PB: predicated region body
PF: predicated region fallthrough
CT: control target
= control target key end

     0   :  { %8 = vsyncpa [#allocation3], 0  ;;  %s717_s0 = inlined_call_operand.vmem [shape: bf16[6,7,3], index: 0, kind: input, shape index: {}]   ;;  %s718_s1 = inlined_call_operand.vmem [shape: bf16[2,3,32], index: 1, kind: input, shape index: {}]   ;;  %s719_s2 = inlined_call_operand.vmem [shape: f32[1,32], index: 2, kind: input, shape index: {}]   ;;  %s720_s3 = inlined_call_operand.hbm [shape: bf16[6,6,32], index: 3, kind: output, shape index: {}]  }
   0x1   :  { %10 = vsyncpa [#allocation3 + $0x1], 0  ;;  %s579_s12 = smov 0   ;;  %s581_s13 = smov 0  }
   0x2   :  { %s583_s14 = smov 0   ;;  %s585_s15 = smov 0  }
   0x3 LB: > { %s600_s16 = sadd.s32 4294967295, %s547_s15   ;;  %s392_s17 = sadd.s32 4294967294, %s547_s15   ;;  %s547_s15 = sphi %s585_s15, %s726_s15   ;;  %s543_s14 = sphi %s583_s14, %s725_s14   ;;  %s539_s13 = sphi %s581_s13, %s724_s13   ;;  %s535_s12 = sphi %s579_s12, %s723_s12  }
   0x4   : > { %s604_s18 = sadd.s32 1, %s547_s15   ;;  %s91_s19 = sadd.s32 1, %s543_s14 }
   0x5   : > { %s88_s20 = ssub.s32 %s547_s15, %s604_s18  ;;  %p101_p0 = scmp.ne.s32.totalorder %s543_s14, %s539_s13 }
   0x6   : > { %p89_p1 = scmp.eq.s32.totalorder %s88_s20, 0  ;;  %p102_p2 = scmp.eq.s32.totalorder %s600_s16, 2 }
   0x7   : > { %p107_p3 = scmp.ne.s32.totalorder %s539_s13, %s535_s12  ;;  %p108_p4 = scmp.eq.s32.totalorder %s392_s17, 2 }
   0x8   : > { %s615_s21 = scalar_select %p89_p1, %s543_s14, %s91_s19  }
   0x9   : > { %p617_p5 = por %p102_p2, %p101_p0  ;;  %p621_p6 = por %p108_p4, %p107_p3 }
   0xa   : > { %p395_p7 = scmp.ge.s32.totalorder %s547_s15, 1  ;;  %p141_p8 = scmp.lt.s32.totalorder %s547_s15, 4 }
   0xc   : > { %p142_p9 = pnand %p395_p7, %p141_p8 }
   0xd   : > { %s162_s24 = sand.u32 (!%p142_p9), 1, %s539_s13   ;;  %s397_s25 = sshll.u32 (!%p142_p9), %s600_s16, 1 }
   0xe   : > { %145 = sbr.rel (%p142_p9) target bundleno = 273 (0x111), region = 32  ;;  %s631_s26 = sshll.u32 (!%p142_p9), %s162_s24, 3 }
   0xf   : > { %p166_p10 = scmp.lt.s32.totalorder (!%p142_p9), %s397_s25, 5  ;;  %s164_s4 = scalar_lea.vmem (!%p142_p9), [#allocation2], %s631_s26 }
  0x10   : > { %s639_s5 = smov (!%p142_p9), 0  }
  0x15   : > { %s728_s25 = smov (!%p166_p10, %s397_s25), 5 }
  0x16   : > { %s398_s27 = sshll.u32 %s728_s25, 2 }
  0x17   : > { %s636_s30 = scalar_lea.vmem %s717_s0, %s398_s27 }
  0x18 LB: >> { %v182_v0 = vld [vmem:[%s718_s1] sm:$0x3]  ;;  %vm199_vm0 = vcmask 1040384   ;;  %vm200_vm1 = vcmask 1041408   ;;  %v553_v1 = vmov 0.0   ;;  %v554_v2 = vmov 65535   ;;  %s551_s5 = sphi %s639_s5, %s178_s5  }
  0x19   : >> { %422 = vmatprep.subr.bf16.mxu1 %v553_v1  ;;  %v201_v3 = vsel %vm199_vm0, 4294967295, %v554_v2  ;;  %416 = vmatprep.subr.bf16.mxu0 %v553_v1  ;;  %v400_v4 = vld [vmem:[%s718_s1 + $0x2] sm:$0x3]  ;;  %vm555_vm2 = vmmov 0   ;;  %s399_s10 = sshll.u32 %s551_s5, 2  ;;  %vm195_vm3 = vcmask 23552  }
  0x1a   : >> { %v202_v5 = vsel %vm200_vm1, %v201_v3, 0  ;;  %424 = vmatprep.mubr.msk.bf16.mxu1 %vm555_vm2, %v553_v1  ;;  %418 = vmatprep.mubr.msk.bf16.mxu0 %vm555_vm2, %v553_v1  ;;  %s180_s11 = scalar_lea.vmem %s636_s30, %s399_s10  ;;  %v404_v19 = vld [vmem:[%s719_s2] ss:$0 sm:$0xff]  ;;  %s304_s20 = scalar_lea.vmem %s164_s4, %s399_s10 [#allocation2]  ;;  %vm305_vm4 = vcmask 256000  }
  0x1b   : >> { %v250_v6 = vand.u32 %v202_v5, %v182_v0  ;;  %v204_v7 = vand.u32 %v400_v4, %v202_v5  ;;  %v181_v8 = vld [vmem:[%s180_s11] sm:$0xf]  ;;  %s178_s5 = sadd.s32 1, %s551_s5  }
  0x1c   : >> { %v401_v9 = vcombine.low %v181_v8, %v181_v8  ;;  %p175_p11 = scmp.ge.s32.totalorder %s178_s5, 2  }
  0x1d   : >> { %423 = vmatpush3.bf16.msra.mxu1 %v250_v6  ;;  %417 = vmatpush3.bf16.msra.mxu0 %v204_v7  ;;  %s411_s25 = sshll.u32 (%p175_p11), %s600_s16, 7  ;;  %s321_s6 = sshll.u32 (%p175_p11), %s164_s4, 4  ;;  %s672_s6 = int_to_ptr.vmem [resolvable:$true] %s321_s6 }
  0x1e   : >> { %v189_v10 = vshrl.u32 %v401_v9, 16  ;;  %v191_v11 = vshll.u32 %v401_v9, 16  ;;  %s668_s29 = scalar_lea.hbm (%p175_p11), %s720_s3, %s411_s25  ;;  %s676_s5 = scalar_lea.sflag (%p175_p11), [#allocation3], %s162_s24 }
  0x1f   : > { %s481_s30 = scalar_lea.vmem (%p175_p11), %s672_s6, 128  ;;  %s556_s16 = smov (%p175_p11), [#allocation2]  }
  0x20   : >> { %425 = vmatmul.mubr.msk.bf16.vlgmr.msra.gmra.mrb[0].mxu1 %vm195_vm3, %v181_v8  ;;  %v193_v12 = vrot.slane %v191_v11, 1  ;;  %p482_p12 = scmp.ne.s32.totalorder (%p175_p11), %s672_s6, %s481_s30  ;;  %s485_s7 = sshll.u32 (%p175_p11), %s556_s16, 4  ;;  %s486_s7 = int_to_ptr.vmem [resolvable:$false] %s485_s7 }
  0x21   : > { %s487_s8 = scalar_lea.vmem (%p175_p11), %s486_s7, 256  ;;  %p488_p1 = scmp.lt.s32.totalorder (%p175_p11), %s672_s6, %s486_s7 }
  0x22   : >> { %v194_v13 = vor.u32 %v193_v12, %v189_v10  ;;  %p483_p13 = pnand (%p175_p11), %p482_p12, %p617_p5  ;;  %p489_p2 = scmp.lt.s32.totalorder (%p175_p11), %s487_s8, %s481_s30 }
  0x24   : >> { %419 = vmatmul.mubr.msk.bf16.vlgmr.msra.gmra.mrb[0].mxu0 %vm195_vm3, %v194_v13  ;;  %p484_p0 = pneg (%p175_p11), %p483_p13  ;;  %p490_p3 = por (%p175_p11), %p489_p2, %p488_p1 }
  0x26   : > { %p491_p4 = pnand (%p175_p11), %p490_p3, %p484_p0 }
  0xf3   : >> { %v286_v14 = vpop.f32.mrb[0].mxu1 }
  0xf4   : >> { %v426_v15 = vpop.f32.mrb[1].mxu1 }
  0xf5   : >> { %v289_v16 = vpop.f32.mrb[2].mxu1 }
  0xf6   : >> { %v427_v17 = vpop.f32.mrb[3].mxu1 }
  0xf7   : >> { %v240_v18 = vpop.f32.mrb[0].mxu0 }
  0xf8   : >> { %v287_v20 = vadd.f32 %v286_v14, %v240_v18  ;;  %v420_v21 = vpop.f32.mrb[1].mxu0 }
  0xf9   : >> { %v243_v22 = vpop.f32.mrb[2].mxu0 }
  0xfa   : >> { %v299_v23 = vadd.f32 %v404_v19, %v287_v20  ;;  %v421_v24 = vpop.f32.mrb[3].mxu0 }
  0xfc   : >> { %v300_v25 = vmul.f32 0.1, %v299_v23  ;;  %177 = sbr.rel (!%p175_p11) target bundleno = 24 (0x18), region = 77 }
  0xfe   : >> { %v301_v26 = vmax.f32 %v299_v23, %v300_v25 }
 0x100   : >> { %v302_v27 = vpack.c.bf16 %v301_v26, %v301_v26 }
 0x102   : >> { %306 = vst.msk [vmem:[%s304_s20] sm:$0x7] %vm305_vm4, %v302_v27 }
 0x103   : > { %494 = shalt.err (!%p491_p4)
}
 0x104   : > { %s495_s24 = scalar_lea.hbm %s668_s29, 128  ;;  %s499_s9 = scalar_lea.hbm %s720_s3, 384 }
 0x105   : > { %p496_p7 = scmp.ne.s32.totalorder %s668_s29, %s495_s24  ;;  %p500_p10 = scmp.lt.u32.totalorder %s668_s29, %s720_s3 }
 0x106   : > { %p501_p11 = scmp.lt.u32.totalorder %s499_s9, %s495_s24  ;;  %p503_p13 = scmp.lt.u32.totalorder %s495_s24, %s668_s29 }
 0x107   : > { %p497_p8 = pnand %p496_p7, %p617_p5 }
 0x108   : > { %p502_p12 = por %p501_p11, %p500_p10 }
 0x109   : > { %p498_p9 = pneg %p497_p8 }
 0x10a   : > { %p504_p0 = por %p503_p13, %p502_p12 }
 0x10c   : > { %p505_p1 = pnand %p504_p0, %p498_p9 }
 0x10e   : > { %508 = shalt.err (!%p505_p1)
}
 0x10f   : > { %s557_s17 = smov 64   ;;  %s558_s19 = smov 4  }
 0x110   : > { %428 = dma.vmem_to_hbm [thread:$0]  (%p617_p5), %s672_s6, 128, %s668_s29, %s676_s5, %s557_s17, %s557_s17, %s558_s19  }
 0x111 PF: > { %p434_p2 = scmp.ge.s32.totalorder %s547_s15, 2  ;;  %s336_s20 = sand.u32 1, %s535_s12  }
 0x112   : > { %s337_s25 = scalar_lea.sflag [#allocation3], %s336_s20 }
 0x113   : > { %p431_p3 = pnand %p434_p2, %p621_p6 }
 0x115   : > { %530 = dma.done.wait (!%p431_p3), %s337_s25, 128  }
 0x116   : > { %532 = vsyncadd (!%p431_p3), %s337_s25, 4294967168  ;;  %p13_p4 = scmp.ge.s32.totalorder %s604_s18, 5   ;;  %s723_s12 = smov %s539_s13 }
 0x117   : > { %s724_s13 = smov %s543_s14  ;;  %s725_s14 = smov %s615_s21 }
 0x118   : > { %s726_s15 = smov %s604_s18  ;;  %15 = sbr.rel (!%p13_p4) target bundleno = 3 (0x3), region = 88 }
 0x11f   :  { %342 = vsyncpa [#allocation3], 1 }
 0x120   :  { %344 = vsyncpa [#allocation3 + $0x1], 1 }

// kernel: tpu_custom_call.1
= control target key start
LH: loop header
LB: loop body
LE: loop exit
PB: predicated region body
PF: predicated region fallthrough
CT: control target
= control target key end

     0   :  { %8 = vsyncpa [#allocation3], 0  ;;  %s717_s0 = inlined_call_operand.vmem [shape: bf16[6,7,3], index: 0, kind: input, shape index: {}]   ;;  %s718_s1 = inlined_call_operand.vmem [shape: bf16[2,3,32], index: 1, kind: input, shape index: {}]   ;;  %s719_s2 = inlined_call_operand.vmem [shape: f32[1,32], index: 2, kind: input, shape index: {}]   ;;  %s720_s3 = inlined_call_operand.hbm [shape: bf16[6,6,32], index: 3, kind: output, shape index: {}]  }
   0x1   :  { %10 = vsyncpa [#allocation3 + $0x1], 0  ;;  %s579_s12 = smov 0   ;;  %s581_s13 = smov 0  }
   0x2   :  { %s583_s14 = smov 0   ;;  %s585_s15 = smov 0  }
   0x3 LB: > { %s600_s16 = sadd.s32 4294967295, %s547_s15   ;;  %s392_s17 = sadd.s32 4294967294, %s547_s15   ;;  %s547_s15 = sphi %s585_s15, %s726_s15   ;;  %s543_s14 = sphi %s583_s14, %s725_s14   ;;  %s539_s13 = sphi %s581_s13, %s724_s13   ;;  %s535_s12 = sphi %s579_s12, %s723_s12  }
   0x4   : > { %s604_s18 = sadd.s32 1, %s547_s15   ;;  %s91_s19 = sadd.s32 1, %s543_s14 }
   0x5   : > { %s88_s20 = ssub.s32 %s547_s15, %s604_s18  ;;  %p101_p0 = scmp.ne.s32.totalorder %s543_s14, %s539_s13 }
   0x6   : > { %p89_p1 = scmp.eq.s32.totalorder %s88_s20, 0  ;;  %p102_p2 = scmp.eq.s32.totalorder %s600_s16, 2 }
   0x7   : > { %p107_p3 = scmp.ne.s32.totalorder %s539_s13, %s535_s12  ;;  %p108_p4 = scmp.eq.s32.totalorder %s392_s17, 2 }
   0x8   : > { %s615_s21 = scalar_select %p89_p1, %s543_s14, %s91_s19  }
   0x9   : > { %p617_p5 = por %p102_p2, %p101_p0  ;;  %p621_p6 = por %p108_p4, %p107_p3 }
   0xa   : > { %p395_p7 = scmp.ge.s32.totalorder %s547_s15, 1  ;;  %p141_p8 = scmp.lt.s32.totalorder %s547_s15, 4 }
   0xc   : > { %p142_p9 = pnand %p395_p7, %p141_p8 }
   0xd   : > { %s162_s24 = sand.u32 (!%p142_p9), 1, %s539_s13   ;;  %s397_s25 = sshll.u32 (!%p142_p9), %s600_s16, 1 }
   0xe   : > { %145 = sbr.rel (%p142_p9) target bundleno = 273 (0x111), region = 32  ;;  %s631_s26 = sshll.u32 (!%p142_p9), %s162_s24, 3 }
   0xf   : > { %p166_p10 = scmp.lt.s32.totalorder (!%p142_p9), %s397_s25, 5  ;;  %s164_s4 = scalar_lea.vmem (!%p142_p9), [#allocation2], %s631_s26 }
  0x10   : > { %s639_s5 = smov (!%p142_p9), 0  }
  0x15   : > { %s728_s25 = smov (!%p166_p10, %s397_s25), 5 }
  0x16   : > { %s398_s27 = sshll.u32 %s728_s25, 2 }
  0x17   : > { %s636_s30 = scalar_lea.vmem %s717_s0, %s398_s27 }
  0x18 LB: >> { %v182_v0 = vld [vmem:[%s718_s1] sm:$0x3]  ;;  %vm199_vm0 = vcmask 1040384   ;;  %vm200_vm1 = vcmask 1041408   ;;  %v553_v1 = vmov 0.0   ;;  %v554_v2 = vmov 65535   ;;  %s551_s5 = sphi %s639_s5, %s178_s5  }
  0x19   : >> { %422 = vmatprep.subr.bf16.mxu1 %v553_v1  ;;  %v201_v3 = vsel %vm199_vm0, 4294967295, %v554_v2  ;;  %416 = vmatprep.subr.bf16.mxu0 %v553_v1  ;;  %v400_v4 = vld [vmem:[%s718_s1 + $0x2] sm:$0x3]  ;;  %vm555_vm2 = vmmov 0   ;;  %s399_s10 = sshll.u32 %s551_s5, 2  ;;  %vm195_vm3 = vcmask 23552  }
  0x1a   : >> { %v202_v5 = vsel %vm200_vm1, %v201_v3, 0  ;;  %424 = vmatprep.mubr.msk.bf16.mxu1 %vm555_vm2, %v553_v1  ;;  %418 = vmatprep.mubr.msk.bf16.mxu0 %vm555_vm2, %v553_v1  ;;  %s180_s11 = scalar_lea.vmem %s636_s30, %s399_s10  ;;  %v404_v19 = vld [vmem:[%s719_s2] ss:$0 sm:$0xff]  ;;  %s304_s20 = scalar_lea.vmem %s164_s4, %s399_s10 [#allocation2]  ;;  %vm305_vm4 = vcmask 256000  }
  0x1b   : >> { %v250_v6 = vand.u32 %v202_v5, %v182_v0  ;;  %v204_v7 = vand.u32 %v400_v4, %v202_v5  ;;  %v181_v8 = vld [vmem:[%s180_s11] sm:$0xf]  ;;  %s178_s5 = sadd.s32 1, %s551_s5  }
  0x1c   : >> { %v401_v9 = vcombine.low %v181_v8, %v181_v8  ;;  %p175_p11 = scmp.ge.s32.totalorder %s178_s5, 2  }
  0x1d   : >> { %423 = vmatpush3.bf16.msra.mxu1 %v250_v6  ;;  %417 = vmatpush3.bf16.msra.mxu0 %v204_v7  ;;  %s411_s25 = sshll.u32 (%p175_p11), %s600_s16, 7  ;;  %s321_s6 = sshll.u32 (%p175_p11), %s164_s4, 4  ;;  %s672_s6 = int_to_ptr.vmem [resolvable:$true] %s321_s6 }
  0x1e   : >> { %v189_v10 = vshrl.u32 %v401_v9, 16  ;;  %v191_v11 = vshll.u32 %v401_v9, 16  ;;  %s668_s29 = scalar_lea.hbm (%p175_p11), %s720_s3, %s411_s25  ;;  %s676_s5 = scalar_lea.sflag (%p175_p11), [#allocation3], %s162_s24 }
  0x1f   : > { %s481_s30 = scalar_lea.vmem (%p175_p11), %s672_s6, 128  ;;  %s556_s16 = smov (%p175_p11), [#allocation2]  }
  0x20   : >> { %425 = vmatmul.mubr.msk.bf16.vlgmr.msra.gmra.mrb[0].mxu1 %vm195_vm3, %v181_v8  ;;  %v193_v12 = vrot.slane %v191_v11, 1  ;;  %p482_p12 = scmp.ne.s32.totalorder (%p175_p11), %s672_s6, %s481_s30  ;;  %s485_s7 = sshll.u32 (%p175_p11), %s556_s16, 4  ;;  %s486_s7 = int_to_ptr.vmem [resolvable:$false] %s485_s7 }
  0x21   : > { %s487_s8 = scalar_lea.vmem (%p175_p11), %s486_s7, 256  ;;  %p488_p1 = scmp.lt.s32.totalorder (%p175_p11), %s672_s6, %s486_s7 }
  0x22   : >> { %v194_v13 = vor.u32 %v193_v12, %v189_v10  ;;  %p483_p13 = pnand (%p175_p11), %p482_p12, %p617_p5  ;;  %p489_p2 = scmp.lt.s32.totalorder (%p175_p11), %s487_s8, %s481_s30 }
  0x24   : >> { %419 = vmatmul.mubr.msk.bf16.vlgmr.msra.gmra.mrb[0].mxu0 %vm195_vm3, %v194_v13  ;;  %p484_p0 = pneg (%p175_p11), %p483_p13  ;;  %p490_p3 = por (%p175_p11), %p489_p2, %p488_p1 }
  0x26   : > { %p491_p4 = pnand (%p175_p11), %p490_p3, %p484_p0 }
  0xf3   : >> { %v286_v14 = vpop.f32.mrb[0].mxu1 }
  0xf4   : >> { %v426_v15 = vpop.f32.mrb[1].mxu1 }
  0xf5   : >> { %v289_v16 = vpop.f32.mrb[2].mxu1 }
  0xf6   : >> { %v427_v17 = vpop.f32.mrb[3].mxu1 }
  0xf7   : >> { %v240_v18 = vpop.f32.mrb[0].mxu0 }
  0xf8   : >> { %v287_v20 = vadd.f32 %v286_v14, %v240_v18  ;;  %v420_v21 = vpop.f32.mrb[1].mxu0 }
  0xf9   : >> { %v243_v22 = vpop.f32.mrb[2].mxu0 }
  0xfa   : >> { %v299_v23 = vadd.f32 %v404_v19, %v287_v20  ;;  %v421_v24 = vpop.f32.mrb[3].mxu0 }
  0xfc   : >> { %v300_v25 = vmul.f32 0.1, %v299_v23  ;;  %177 = sbr.rel (!%p175_p11) target bundleno = 24 (0x18), region = 77 }
  0xfe   : >> { %v301_v26 = vmax.f32 %v299_v23, %v300_v25 }
 0x100   : >> { %v302_v27 = vpack.c.bf16 %v301_v26, %v301_v26 }
 0x102   : >> { %306 = vst.msk [vmem:[%s304_s20] sm:$0x7] %vm305_vm4, %v302_v27 }
 0x103   : > { %494 = shalt.err (!%p491_p4)
}
 0x104   : > { %s495_s24 = scalar_lea.hbm %s668_s29, 128  ;;  %s499_s9 = scalar_lea.hbm %s720_s3, 384 }
 0x105   : > { %p496_p7 = scmp.ne.s32.totalorder %s668_s29, %s495_s24  ;;  %p500_p10 = scmp.lt.u32.totalorder %s668_s29, %s720_s3 }
 0x106   : > { %p501_p11 = scmp.lt.u32.totalorder %s499_s9, %s495_s24  ;;  %p503_p13 = scmp.lt.u32.totalorder %s495_s24, %s668_s29 }
 0x107   : > { %p497_p8 = pnand %p496_p7, %p617_p5 }
 0x108   : > { %p502_p12 = por %p501_p11, %p500_p10 }
 0x109   : > { %p498_p9 = pneg %p497_p8 }
 0x10a   : > { %p504_p0 = por %p503_p13, %p502_p12 }
 0x10c   : > { %p505_p1 = pnand %p504_p0, %p498_p9 }
 0x10e   : > { %508 = shalt.err (!%p505_p1)
}
 0x10f   : > { %s557_s17 = smov 64   ;;  %s558_s19 = smov 4  }
 0x110   : > { %428 = dma.vmem_to_hbm [thread:$0]  (%p617_p5), %s672_s6, 128, %s668_s29, %s676_s5, %s557_s17, %s557_s17, %s558_s19  }
 0x111 PF: > { %p434_p2 = scmp.ge.s32.totalorder %s547_s15, 2  ;;  %s336_s20 = sand.u32 1, %s535_s12  }
 0x112   : > { %s337_s25 = scalar_lea.sflag [#allocation3], %s336_s20 }
 0x113   : > { %p431_p3 = pnand %p434_p2, %p621_p6 }
 0x115   : > { %530 = dma.done.wait (!%p431_p3), %s337_s25, 128  }
 0x116   : > { %532 = vsyncadd (!%p431_p3), %s337_s25, 4294967168  ;;  %p13_p4 = scmp.ge.s32.totalorder %s604_s18, 5   ;;  %s723_s12 = smov %s539_s13 }
 0x117   : > { %s724_s13 = smov %s543_s14  ;;  %s725_s14 = smov %s615_s21 }
 0x118   : > { %s726_s15 = smov %s604_s18  ;;  %15 = sbr.rel (!%p13_p4) target bundleno = 3 (0x3), region = 88 }
 0x11f   :  { %342 = vsyncpa [#allocation3], 1 }
 0x120   :  { %344 = vsyncpa [#allocation3 + $0x1], 1 }

</bundles_post_ra>
